<compile_context>
chip_gen: v7x
topology: tpu7x:2x2x1
jax: 0.10.0
libtpu: 0.0.40
codegen_flags: <defaults>
</compile_context>

<pallas_src>
import jax
import jax.numpy as jnp
from jax.experimental import pallas as pl
from jax.experimental.pallas import tpu as pltpu


def _round_up(x: int, m: int) -> int:
    return ((x + m - 1) // m) * m


# ----------------------------------------------------------------------------
# Kernels
# ----------------------------------------------------------------------------
def _linear_kernel_single_k(x_ref, w_ref, b_ref, o_ref):
    # x_ref: (tm, K), w_ref: (K, tn), b_ref: (1, tn), o_ref: (tm, tn)
    acc = jnp.dot(x_ref[...], w_ref[...], preferred_element_type=jnp.float32)
    o_ref[...] = (acc + b_ref[...].astype(jnp.float32)).astype(o_ref.dtype)


def _linear_kernel_multi_k(x_ref, w_ref, b_ref, o_ref, acc_ref):
    # x_ref: (tm, tk), w_ref: (tk, tn), b_ref: (1, tn), o_ref: (tm, tn)
    # acc_ref: (tm, tn) f32 scratch, resident across the K grid axis.
    k = pl.program_id(2)

    @pl.when(k == 0)
    def _init():
        acc_ref[...] = jnp.zeros_like(acc_ref)

    acc_ref[...] += jnp.dot(
        x_ref[...], w_ref[...], preferred_element_type=jnp.float32
    )

    @pl.when(k == pl.num_programs(2) - 1)
    def _finalize():
        out = acc_ref[...] + b_ref[...].astype(jnp.float32)  # bias added once
        o_ref[...] = out.astype(o_ref.dtype)


# ----------------------------------------------------------------------------
# Wrapper
# ----------------------------------------------------------------------------
_TM_MAX = 512
_TN_MAX = 512
_TK_MAX = 512


def _pick_tiles(m: int, k: int, n: int, itemsize: int):
    # Sublane packing: 8 rows per vreg for 4-byte dtypes, 16 for 2-byte.
    sub = 8 if itemsize >= 4 else 16
    tm = min(_TM_MAX, _round_up(m, sub))
    tk = min(_TK_MAX, _round_up(k, 128))
    tn = min(_TN_MAX, _round_up(n, 128))
    return tm, tk, tn


@jax.jit
def linear_forward(x, weight, bias):
    """y = x @ weight + bias, applied to the last axis of x.

    x:      (..., input_dim)
    weight: (input_dim, hidden_dim)
    bias:   (hidden_dim,)
    returns (..., hidden_dim)
    """
    input_dim, hidden_dim = weight.shape
    lead_shape = x.shape[:-1]
    M = 1
    for d in lead_shape:
        M *= d
    K, N = input_dim, hidden_dim

    itemsize = jnp.dtype(x.dtype).itemsize
    tm, tk, tn = _pick_tiles(M, K, N, itemsize)

    # Pad every dim to a tile multiple so all blocks are full / (8,128)-aligned.
    M_pad = _round_up(M, tm)
    K_pad = _round_up(K, tk)
    N_pad = _round_up(N, tn)

    x2d = x.reshape(M, K)
    if (M_pad, K_pad) != (M, K):
        x2d = jnp.pad(x2d, ((0, M_pad - M), (0, K_pad - K)))
    w2d = weight
    if (K_pad, N_pad) != (K, N):
        w2d = jnp.pad(w2d, ((0, K_pad - K), (0, N_pad - N)))
    b2d = bias.reshape(1, N)
    if N_pad != N:
        b2d = jnp.pad(b2d, ((0, 0), (0, N_pad - N)))

    single_k = K_pad <= tk  # whole contraction dim fits in one VMEM tile

    cost = pl.CostEstimate(
        flops=2 * M_pad * K_pad * N_pad,
        bytes_accessed=(M_pad * K_pad + K_pad * N_pad + N_pad + M_pad * N_pad)
        * itemsize,
        transcendentals=0,
    )

    if single_k:
        # ---- 2-D grid, no accumulator, no reduction axis --------------------
        grid = (pl.cdiv(M_pad, tm), pl.cdiv(N_pad, tn))
        vmem_est = (
            2 * (tm * K_pad + K_pad * tn + tn) * itemsize  # x, w, bias buffers
            + 2 * tm * tn * itemsize                       # output buffers
        )
        vmem_limit = int(min(48 * 1024 * 1024, max(32 * 1024 * 1024, 2 * vmem_est)))

        out = pl.pallas_call(
            _linear_kernel_single_k,
            out_shape=jax.ShapeDtypeStruct((M_pad, N_pad), x.dtype),
            grid_spec=pltpu.PrefetchScalarGridSpec(
                num_scalar_prefetch=0,
                grid=grid,
                in_specs=[
                    pl.BlockSpec((tm, K_pad), lambda i, j: (i, 0)),  # x tile
                    pl.BlockSpec((K_pad, tn), lambda i, j: (0, j)),  # weight tile
                    pl.BlockSpec((1, tn), lambda i, j: (0, j)),      # bias tile
                ],
                out_specs=pl.BlockSpec((tm, tn), lambda i, j: (i, j)),
            ),
            compiler_params=pltpu.CompilerParams(
                dimension_semantics=("parallel", "parallel"),
                vmem_limit_bytes=vmem_limit,
            ),
            cost_estimate=cost,
        )(x2d, w2d, b2d)
    else:
        # ---- 3-D grid with K reduction last ---------------------------------
        grid = (pl.cdiv(M_pad, tm), pl.cdiv(N_pad, tn), pl.cdiv(K_pad, tk))
        vmem_est = (
            2 * (tm * tk + tk * tn + tn) * itemsize  # x, w, bias pipeline buffers
            + 2 * tm * tn * itemsize                 # output buffers
            + tm * tn * 4                            # f32 accumulator scratch
        )
        vmem_limit = int(min(48 * 1024 * 1024, max(32 * 1024 * 1024, 2 * vmem_est)))

        out = pl.pallas_call(
            _linear_kernel_multi_k,
            out_shape=jax.ShapeDtypeStruct((M_pad, N_pad), x.dtype),
            grid_spec=pltpu.PrefetchScalarGridSpec(
                num_scalar_prefetch=0,
                grid=grid,
                in_specs=[
                    pl.BlockSpec((tm, tk), lambda i, j, k: (i, k)),  # x tile
                    pl.BlockSpec((tk, tn), lambda i, j, k: (k, j)),  # weight tile
                    pl.BlockSpec((1, tn), lambda i, j, k: (0, j)),   # bias tile
                ],
                out_specs=pl.BlockSpec((tm, tn), lambda i, j, k: (i, j)),
                scratch_shapes=[pltpu.VMEM((tm, tn), jnp.float32)],
            ),
            compiler_params=pltpu.CompilerParams(
                dimension_semantics=("parallel", "parallel", "arbitrary"),
                vmem_limit_bytes=vmem_limit,
            ),
            cost_estimate=cost,
        )(x2d, w2d, b2d)

    # Slice off padding before reshaping back.
    out = out[:M, :N]
    return out.reshape(*lead_shape, hidden_dim)


# ----------------------------------------------------------------------------
# Self-test
# ----------------------------------------------------------------------------
if __name__ == "__main__":
    key = jax.random.PRNGKey(0)

    # --- Case 1: module-default shapes (depth=1 Linear), exercises 2-D path --
    batch, seq, input_dim, hidden_dim = 2, 8, 32, 64
    kx, kw, kb, key = jax.random.split(key, 4)

    x = jax.random.normal(kx, (batch, seq, input_dim), dtype=jnp.float32)
    bound = 1.0 / (input_dim ** 0.5)  # PyTorch-style U(-1/sqrt(fan_in), ...)
    weight = jax.random.uniform(
        kw, (input_dim, hidden_dim), dtype=jnp.float32, minval=-bound, maxval=bound
    )
    bias = jax.random.uniform(
        kb, (hidden_dim,), dtype=jnp.float32, minval=-bound, maxval=bound
    )

    y = linear_forward(x, weight, bias)
    jax.block_until_ready(y)
    y_ref = x @ weight + bias
    assert y.shape == (batch, seq, hidden_dim)
    assert jnp.allclose(y, y_ref, atol=1e-5, rtol=1e-5)

    # --- Case 2: larger, unaligned K to exercise the 3-D reduction path ------
    batch2, seq2, input_dim2, hidden_dim2 = 4, 8, 600, 96
    kx2, kw2, kb2, key = jax.random.split(key, 4)

    x2 = jax.random.normal(kx2, (batch2, seq2, input_dim2), dtype=jnp.float32)
    bound2 = 1.0 / (input_dim2 ** 0.5)
    weight2 = jax.random.uniform(
        kw2, (input_dim2, hidden_dim2), dtype=jnp.float32,
        minval=-bound2, maxval=bound2,
    )
    bias2 = jax.random.uniform(
        kb2, (hidden_dim2,), dtype=jnp.float32, minval=-bound2, maxval=bound2
    )

    y2 = linear_forward(x2, weight2, bias2)
    jax.block_until_ready(y2)
    y2_ref = x2 @ weight2 + bias2
    assert y2.shape == (batch2, seq2, hidden_dim2)
    assert jnp.allclose(y2, y2_ref, atol=1e-4, rtol=1e-4)

    print("KERNEL_OK")
</pallas_src>

<mosaic_0001>
module attributes {stable_mosaic.version = 11 : i64} {
  func.func @_linear_kernel_single_k(%arg0: i32, %arg1: i32, %arg2: memref<16x128xf32, #tpu.memory_space<vmem>>, %arg3: memref<128x128xf32, #tpu.memory_space<vmem>>, %arg4: memref<1x128xf32, #tpu.memory_space<vmem>>, %arg5: memref<16x128xf32, #tpu.memory_space<vmem>>) attributes {dimension_semantics = [#tpu.dimension_semantics<parallel>, #tpu.dimension_semantics<parallel>], iteration_bounds = array<i64: 1, 1>, scalar_prefetch = 0 : i64, scratch_operands = 0 : i64, tpu.core_type = #tpu.core_type<tc>, window_params = [{transform_indices = @transform_0, window_bounds = array<i64: 16, 128>}, {transform_indices = @transform_1, window_bounds = array<i64: 128, 128>}, {transform_indices = @transform_2, window_bounds = array<i64: 1, 128>}, {transform_indices = @transform_3, window_bounds = array<i64: 16, 128>}]} {
    %c0 = arith.constant 0 : index
    %c0_0 = arith.constant 0 : index
    %0 = vector.load %arg2[%c0, %c0_0] : memref<16x128xf32, #tpu.memory_space<vmem>>, vector<16x128xf32>
    %c0_1 = arith.constant 0 : index
    %c0_2 = arith.constant 0 : index
    %1 = vector.load %arg3[%c0_1, %c0_2] : memref<128x128xf32, #tpu.memory_space<vmem>>, vector<128x128xf32>
    %cst = arith.constant dense<0.000000e+00> : vector<16x128xf32>
    %2 = tpu.matmul %0, %1, %cst {dimension_numbers = #tpu.dot_dimension_numbers<[1], [0], [0], [1], [0, 0, 1, 1], [], []>} : vector<16x128xf32>, vector<128x128xf32>, vector<16x128xf32> -> vector<16x128xf32>
    %c0_3 = arith.constant 0 : index
    %c0_4 = arith.constant 0 : index
    %3 = vector.load %arg4[%c0_3, %c0_4] : memref<1x128xf32, #tpu.memory_space<vmem>>, vector<1x128xf32>
    %4 = vector.broadcast %3 : vector<1x128xf32> to vector<16x128xf32>
    %5 = arith.addf %2, %4 : vector<16x128xf32>
    %c0_5 = arith.constant 0 : index
    %c0_6 = arith.constant 0 : index
    %6 = vector.load %arg5[%c0_5, %c0_6] : memref<16x128xf32, #tpu.memory_space<vmem>>, vector<16x128xf32>
    tpu.vector_store %arg5[%c0_5, %c0_6], %5 {strides = array<i32>} : memref<16x128xf32, #tpu.memory_space<vmem>>, vector<16x128xf32>,
    return
  }
  func.func @transform_0(%arg0: i32, %arg1: i32) -> (i32, i32) {
    %c0_i32 = arith.constant 0 : i32
    %c0_i32_0 = arith.constant 0 : i32
    return %arg0, %c0_i32 : i32, i32
  }
  func.func @transform_1(%arg0: i32, %arg1: i32) -> (i32, i32) {
    %c0_i32 = arith.constant 0 : i32
    %c0_i32_0 = arith.constant 0 : i32
    return %c0_i32, %arg1 : i32, i32
  }
  func.func @transform_2(%arg0: i32, %arg1: i32) -> (i32, i32) {
    %c0_i32 = arith.constant 0 : i32
    %c0_i32_0 = arith.constant 0 : i32
    return %c0_i32, %arg1 : i32, i32
  }
  func.func @transform_3(%arg0: i32, %arg1: i32) -> (i32, i32) {
    %c0_i32 = arith.constant 0 : i32
    return %arg0, %arg1 : i32, i32
  }
}

</mosaic_0001>

<bundles_post_ra>
// kernel: linear_forward.1
= control target key start
LH: loop header
LB: loop body
LE: loop exit
PB: predicated region body
PF: predicated region fallthrough
CT: control target
= control target key end

     0   :  { %s289_s1 = inlined_call_operand.vmem [shape: f32[128,128], index: 1, kind: input, shape index: {}]   ;;  %s290_s0 = inlined_call_operand.vmem [shape: f32[16,128], index: 0, kind: input, shape index: {}]   ;;  %s291_s2 = inlined_call_operand.vmem [shape: f32[1,128], index: 2, kind: input, shape index: {}]   ;;  %s292_s3 = inlined_call_operand.vmem [shape: f32[16,128], index: 3, kind: output, shape index: {}]  }
   0x1   :  { %v16_v0 = vld [vmem:[%s289_s1] sm:$0xff]  ;;  %v17_v1 = vld [vmem:[%s289_s1 + $0x8] sm:$0xff]  ;;  %v18_v2 = vld [vmem:[%s289_s1 + $0x10] sm:$0xff] }
   0x2   :  { %v174_v3 = vpack.c.bf16 %v17_v1, %v16_v0  ;;  %v19_v4 = vld [vmem:[%s289_s1 + $0x18] sm:$0xff]  ;;  %v20_v6 = vld [vmem:[%s289_s1 + $0x20] sm:$0xff]  ;;  %v21_v7 = vld [vmem:[%s289_s1 + $0x28] sm:$0xff] }
   0x3   :  { %v178_v5 = vpack.c.bf16 %v19_v4, %v18_v2  ;;  %v182_v8 = vpack.c.bf16 %v21_v7, %v20_v6  ;;  %v14_v9 = vld [vmem:[%s290_s0] sm:$0xff]  ;;  %v22_v10 = vld [vmem:[%s289_s1 + $0x30] sm:$0xff]  ;;  %v23_v11 = vld [vmem:[%s289_s1 + $0x38] sm:$0xff] }
   0x4   :  { %175 = vmatprep.subr.bf16.mxu0 %v174_v3  ;;  %171 = vmatprep.mubr.f32.mxu0 %v14_v9  ;;  %v186_v12 = vpack.c.bf16 %v23_v11, %v22_v10  ;;  %v24_v13 = vld [vmem:[%s289_s1 + $0x40] sm:$0xff]  ;;  %v25_v14 = vld [vmem:[%s289_s1 + $0x48] sm:$0xff]  ;;  %v26_v16 = vld [vmem:[%s289_s1 + $0x50] sm:$0xff] }
   0x5   :  { %177 = vmatpush3.bf16.msra.mxu0 %v174_v3  ;;  %v190_v15 = vpack.c.bf16 %v25_v14, %v24_v13  ;;  %v27_v17 = vld [vmem:[%s289_s1 + $0x58] sm:$0xff]  ;;  %v28_v19 = vld [vmem:[%s289_s1 + $0x60] sm:$0xff]  ;;  %v29_v20 = vld [vmem:[%s289_s1 + $0x68] sm:$0xff] }
   0x6   :  { %179 = vmatprep.subr.bf16.mxu0 %v178_v5  ;;  %v194_v18 = vpack.c.bf16 %v27_v17, %v26_v16  ;;  %v198_v21 = vpack.c.bf16 %v29_v20, %v28_v19  ;;  %v30_v22 = vld [vmem:[%s289_s1 + $0x70] sm:$0xff]  ;;  %v31_v23 = vld [vmem:[%s289_s1 + $0x78] sm:$0xff]  ;;  %v15_v25 = vld [vmem:[%s290_s0 + $0x8] sm:$0xff] }
   0x7   :  { %v202_v24 = vpack.c.bf16 %v31_v23, %v30_v22  ;;  %v120_v26 = vld [vmem:[%s291_s2] ss:$0 sm:$0xff] }
   0x9   :  { %181 = vmatpush3.bf16.msra.mxu0 %v178_v5 }
   0xa   :  { %183 = vmatprep.subr.bf16.mxu0 %v182_v8 }
   0xd   :  { %185 = vmatpush3.bf16.msra.mxu0 %v182_v8 }
   0xe   :  { %187 = vmatprep.subr.bf16.mxu0 %v186_v12 }
  0x11   :  { %189 = vmatpush3.bf16.msra.mxu0 %v186_v12 }
  0x12   :  { %191 = vmatprep.subr.bf16.mxu0 %v190_v15 }
  0x15   :  { %193 = vmatpush3.bf16.msra.mxu0 %v190_v15 }
  0x16   :  { %195 = vmatprep.subr.bf16.mxu0 %v194_v18 }
  0x19   :  { %197 = vmatpush3.bf16.msra.mxu0 %v194_v18 }
  0x1a   :  { %199 = vmatprep.subr.bf16.mxu0 %v198_v21 }
  0x1d   :  { %201 = vmatpush3.bf16.msra.mxu0 %v198_v21 }
  0x1e   :  { %203 = vmatprep.subr.bf16.mxu0 %v202_v24 }
  0x21   :  { %205 = vmatpush3.bf16.msra.mxu0 %v202_v24 }
  0x24   :  { %172 = vmatmul.mubr.f32.vlgmr.msra.gmra.mrb[0].mxu0 %v15_v25 }
  0xf7   :  { %v173_v27 = vpop.f32.mrb[0].mxu0 }
  0xf8   :  { %v111_v28 = vadd.f32 %v173_v27, %v120_v26  ;;  %v105_v29 = vpop.f32.mrb[1].mxu0 }
  0xf9   :  { %v106_v30 = vadd.f32 %v120_v26, %v105_v29 }
  0xfa   :  { %115 = vst [vmem:[%s292_s3 + $0x8] sm:$0xff] %v111_v28 }
  0xfb   :  { %114 = vst [vmem:[%s292_s3] sm:$0xff] %v106_v30 }

</bundles_post_ra>
